<compile_context>
chip_gen: v7x
topology: tpu7x:2x2x1
jax: 0.10.0
libtpu: 0.0.40
codegen_flags: <defaults>
</compile_context>

<pallas_src>
import numpy as np
import jax
import jax.numpy as jnp
from jax.experimental import pallas as pl
from jax.experimental.pallas import tpu as pltpu

_LANE = 128
_SUBLANE = 8
# ~2 MiB per block buffer; x2 (in+out) x2 (double buffering) ~= 8 MiB VMEM,
# comfortably inside the smallest scoped-VMEM default (16 MiB on v5e).
_TARGET_BLOCK_BYTES = 2 * 1024 * 1024


def _copy_kernel(src_ref, dst_ref):
    # Identity: forward(xyz, points) == xyz
    dst_ref[...] = src_ref[...]


def _lane_dense_copy(flat2d):
    """Tiled identity copy of a lane-dense (rows, lane_w) slab."""
    rows, lane_w = flat2d.shape
    itemsize = flat2d.dtype.itemsize

    block_rows = max(_SUBLANE, _TARGET_BLOCK_BYTES // (lane_w * itemsize))
    block_rows = min(rows, block_rows)
    if block_rows != rows:
        # Keep the (8, 128) tiling constraint when the block is not the full
        # row extent; lane_w is already a multiple of 128.
        block_rows = max(_SUBLANE, (block_rows // _SUBLANE) * _SUBLANE)

    grid = (pl.cdiv(rows, block_rows),)

    return pl.pallas_call(
        _copy_kernel,
        out_shape=jax.ShapeDtypeStruct(flat2d.shape, flat2d.dtype),
        grid_spec=pltpu.PrefetchScalarGridSpec(
            num_scalar_prefetch=0,
            grid=grid,
            in_specs=[pl.BlockSpec((block_rows, lane_w), lambda i: (i, 0))],
            out_specs=pl.BlockSpec((block_rows, lane_w), lambda i: (i, 0)),
        ),
        compiler_params=pltpu.CompilerParams(
            dimension_semantics=("parallel",),
        ),
        # Output may reuse the input HBM buffer when the caller donates it.
        input_output_aliases={0: 0},
    )(flat2d)


def surface_pool(xyz, points):
    """Pallas implementation of SurfacePool.forward(xyz, points) -> xyz.

    xyz:    [B, N, 3]
    points: [B, N, C]  (unused, kept for signature parity with PyTorch)
    """
    del points  # PyTorch forward ignores `points`; never DMA it.
    shape, dtype = xyz.shape, xyz.dtype
    total = int(np.prod(shape))

    # Pick the widest lane dim (multiple of 128) that divides the element
    # count so the copy is lane-dense (unmasked full-width stores).
    lane_w = 0
    for w in (4096, 2048, 1024, 512, 256, 128):
        if total % w == 0:
            lane_w = w
            break

    if lane_w:
        flat = xyz.reshape(total // lane_w, lane_w)
        out = _lane_dense_copy(flat)
        return out.reshape(shape).astype(dtype)

    # Rare remainder path (element count not a multiple of 128): pad to a
    # lane-dense slab, copy, then strip the padding.
    pad = (-total) % _LANE
    flat = jnp.pad(xyz.reshape(-1), (0, pad)).reshape(-1, _LANE)
    out = _lane_dense_copy(flat)
    return out.reshape(-1)[:total].reshape(shape).astype(dtype)


if __name__ == "__main__":
    key = jax.random.PRNGKey(0)
    k_xyz, k_pts = jax.random.split(key)

    B, N, C = 2, 64, 32
    xyz = jax.random.normal(k_xyz, (B, N, 3), dtype=jnp.float32)
    points = jax.random.normal(k_pts, (B, N, C), dtype=jnp.float32)

    # Host snapshot of the expected result (the kernel may alias/donate its
    # reshaped input buffer, so compare against an independent copy).
    expected = np.asarray(xyz)

    out = surface_pool(xyz, points)
    out = jax.block_until_ready(out)

    assert out.shape == xyz.shape
    assert out.dtype == xyz.dtype
    assert np.array_equal(np.asarray(out), expected)

    print("KERNEL_OK")
</pallas_src>

<mosaic_0001>
module attributes {stable_mosaic.version = 11 : i64} {
  func.func @_copy_kernel(%arg0: i32, %arg1: memref<3x128xf32, #tpu.memory_space<vmem>>, %arg2: memref<3x128xf32, #tpu.memory_space<vmem>>) attributes {dimension_semantics = [#tpu.dimension_semantics<parallel>], iteration_bounds = array<i64: 1>, scalar_prefetch = 0 : i64, scratch_operands = 0 : i64, tpu.core_type = #tpu.core_type<tc>, window_params = [{transform_indices = @transform_0, window_bounds = array<i64: 3, 128>}, {transform_indices = @transform_1, window_bounds = array<i64: 3, 128>}]} {
    %c0 = arith.constant 0 : index
    %c0_0 = arith.constant 0 : index
    %0 = vector.load %arg1[%c0, %c0_0] : memref<3x128xf32, #tpu.memory_space<vmem>>, vector<3x128xf32>
    %c0_1 = arith.constant 0 : index
    %c0_2 = arith.constant 0 : index
    %1 = vector.load %arg2[%c0_1, %c0_2] : memref<3x128xf32, #tpu.memory_space<vmem>>, vector<3x128xf32>
    tpu.vector_store %arg2[%c0_1, %c0_2], %0 {strides = array<i32>} : memref<3x128xf32, #tpu.memory_space<vmem>>, vector<3x128xf32>,
    return
  }
  func.func @transform_0(%arg0: i32) -> (i32, i32) {
    %c0_i32 = arith.constant 0 : i32
    %c0_i32_0 = arith.constant 0 : i32
    return %arg0, %c0_i32 : i32, i32
  }
  func.func @transform_1(%arg0: i32) -> (i32, i32) {
    %c0_i32 = arith.constant 0 : i32
    %c0_i32_0 = arith.constant 0 : i32
    return %arg0, %c0_i32 : i32, i32
  }
}

</mosaic_0001>

<bundles_post_ra>
// kernel: tpu_custom_call.1
= control target key start
LH: loop header
LB: loop body
LE: loop exit
PB: predicated region body
PF: predicated region fallthrough
CT: control target
= control target key end

     0   :  { %6 = vsyncpa [#allocation3], 0  ;;  %s124_s0 = inlined_call_operand.hbm [shape: f32[3,128], index: 0, kind: input, shape index: {}, may-alias: {0,1}]   ;;  %s125_s1 = inlined_call_operand.hbm [shape: f32[3,128], index: 1, kind: output, shape index: {}, may-alias: {0,1}]  }
   0x1   :  { %7 = vsyncpa [#allocation4], 0  ;;  %s88_s6 = smov [#allocation2]   ;;  %s40_s10 = scalar_lea.hbm %s124_s0, 64 }
   0x2   :  { %s14_s7 = sshll.u32 %s88_s6, 4  ;;  %p41_p0 = scmp.ne.s32.totalorder %s124_s0, %s40_s10  ;;  %s15_s7 = int_to_ptr.vmem [resolvable:$true] %s14_s7 }
   0x3   :  { %p44_p1 = scmp.lt.u32.totalorder %s40_s10, %s124_s0 }
   0x5   :  { %p46_p2 = pnand %p44_p1, %p41_p0 }
   0x7   :  { %49 = shalt.err (!%p46_p2)
}
   0x8   :  { %s50_s15 = scalar_lea.vmem %s15_s7, 64  ;;  %p55_p4 = scmp.lt.s32.totalorder %s15_s7, %s15_s7 }
   0x9   :  { %p51_p3 = scmp.ne.s32.totalorder %s15_s7, %s50_s15  ;;  %p56_p5 = scmp.lt.s32.totalorder %s50_s15, %s50_s15 }
   0xb   :  { %p57_p6 = por %p56_p5, %p55_p4 }
   0xd   :  { %p58_p7 = pnand %p57_p6, %p51_p3 }
   0xf   :  { %61 = shalt.err (!%p58_p7)
}
  0x10   :  { %17 = dma.hbm_to_vmem [thread:$0]  %s124_s0, 64, %s15_s7, [#allocation3]  }
  0x11   :  { %84 = dma.done.wait [#allocation3], 64  }
  0x12   :  { %85 = vsyncadd [#allocation3], 4294967232  ;;  %s89_s18 = smov [#allocation5]   ;;  %v21_v0 = vld [vmem:[#allocation2] sm:$0x7] }
  0x13   :  { %s29_s19 = sshll.u32 %s89_s18, 4  ;;  %22 = vst [vmem:[#allocation5] sm:$0x7] %v21_v0  ;;  %s30_s19 = int_to_ptr.vmem [resolvable:$true] %s29_s19 }
  0x14   :  { %s62_s20 = scalar_lea.vmem %s30_s19, 64  ;;  %p67_p9 = scmp.lt.s32.totalorder %s30_s19, %s30_s19 }
  0x15   :  { %p63_p8 = scmp.ne.s32.totalorder %s30_s19, %s62_s20  ;;  %p68_p10 = scmp.lt.s32.totalorder %s62_s20, %s62_s20 }
  0x17   :  { %p69_p11 = por %p68_p10, %p67_p9 }
  0x19   :  { %p70_p12 = pnand %p69_p11, %p63_p8 }
  0x1b   :  { %73 = shalt.err (!%p70_p12)
}
  0x1c   :  { %s74_s23 = scalar_lea.hbm %s125_s1, 64 }
  0x1d   :  { %p75_p13 = scmp.ne.s32.totalorder %s125_s1, %s74_s23  ;;  %p78_p0 = scmp.lt.u32.totalorder %s74_s23, %s125_s1 }
  0x1f   :  { %p80_p1 = pnand %p78_p0, %p75_p13 }
  0x21   :  { %83 = shalt.err (!%p80_p1)
}
  0x22   :  { %32 = dma.vmem_to_hbm [thread:$0]  %s30_s19, 64, %s125_s1, [#allocation4]  }
  0x23   :  { %86 = dma.done.wait [#allocation4], 64  }
  0x24   :  { %87 = vsyncadd [#allocation4], 4294967232 }
  0x25   :  { %36 = vsyncpa [#allocation3], 1 }
  0x26   :  { %37 = vsyncpa [#allocation4], 1 }

</bundles_post_ra>
